<compile_context>
chip_gen: v7x
topology: tpu7x:2x2x1
jax: 0.10.0
libtpu: 0.0.40
codegen_flags: <defaults>
</compile_context>

<pallas_src>
import functools

import jax
import jax.numpy as jnp
from jax.experimental import pallas as pl
from jax.experimental.pallas import tpu as pltpu

LANE = 128  # TPU lane width; fc1/fc2 widths are padded to this.


# ----------------------------------------------------------------------------
# Pallas kernel: fused  pooler(tanh) -> fc1 -> ReLU -> (dropout=id) -> fc2
# ----------------------------------------------------------------------------
def fused_head_kernel(x_ref, w_ref, b_ref, o_ref):
    # x: [TB, H]  w: [3, H, 128] = (pool_w, w1_pad, w2_pad)  b: [3, 128]
    x = x_ref[...]

    # BERT pooler: tanh(x @ pool_w + pool_b)      (tanh -> EUP slot, ~free)
    p = jnp.dot(x, w_ref[0], preferred_element_type=jnp.float32)
    p = jnp.tanh(p + b_ref[0:1, :])

    # fc1 -> ReLU.  Dropout(p=0.2) is identity in eval mode.
    # TODO(synk): training-mode dropout would use pltpu.prng_seed +
    #             pltpu.stateful_bernoulli with 1/(1-p) scaling.
    h = jnp.dot(p, w_ref[1], preferred_element_type=jnp.float32)
    h = jnp.maximum(h + b_ref[1:2, :], 0.0)

    # fc2 (columns >= num_class carry zero weights/bias -> harmless padding).
    y = jnp.dot(h, w_ref[2], preferred_element_type=jnp.float32)
    o_ref[...] = (y + b_ref[2:3, :]).astype(o_ref.dtype)


# ----------------------------------------------------------------------------
# Wrapper: pad/stack parameters, tile over batch, call pallas_call.
# ----------------------------------------------------------------------------
@functools.partial(jax.jit, static_argnames=("num_class",))
def sentiment_classifier_forward(x_mean, pool_w, pool_b, w1, b1, w2, b2,
                                 num_class):
    """x_mean: [B, H] masked-mean token features -> logits [B, num_class]."""
    B, H = x_mean.shape
    F1 = w1.shape[1]
    C = w2.shape[1]
    # Stacked-parameter fast path is specialized to hidden_size == 128.
    # TODO(synk): for real BERT hidden sizes (e.g. 768) keep pool_w/pool_b as
    #             separate [H,H]/[1,H] operands and pad H to a multiple of 128.
    assert H == LANE, "this fused kernel assumes bert_config.hidden_size == 128"
    assert pool_w.shape == (H, H) and pool_b.shape == (H,)
    assert w1.shape == (H, F1) and b1.shape == (F1,)
    assert w2.shape == (F1, C) and b2.shape == (C,)
    assert F1 <= LANE and C <= LANE

    # Zero-pad fc1/fc2 to lane-dense 128 columns (and 128 rows for w2).
    w1p = jnp.pad(w1, ((0, 0), (0, LANE - F1)))
    w2p = jnp.pad(w2, ((0, LANE - F1), (0, LANE - C)))
    b1p = jnp.pad(b1, (0, LANE - F1))
    b2p = jnp.pad(b2, (0, LANE - C))

    W = jnp.stack([pool_w, w1p, w2p])          # [3, H, 128]
    Bias = jnp.stack([pool_b, b1p, b2p])       # [3, 128]

    # Batch tiling: TB rows per grid step (multiple of 8, capped at 256 so a
    # step fills a full MXU pass on v6e/v7x; trivially grid=(1,) for tiny B).
    TB = min(256, ((B + 7) // 8) * 8)
    Bp = pl.cdiv(B, TB) * TB
    if Bp != B:
        x_mean = jnp.pad(x_mean, ((0, Bp - B), (0, 0)))
    grid = (Bp // TB,)

    cost = pl.CostEstimate(
        flops=2 * Bp * (H * H + H * LANE + LANE * LANE),
        transcendentals=Bp * H,  # tanh
        bytes_accessed=4 * (Bp * H + 3 * H * LANE + 3 * LANE + Bp * LANE),
    )

    logits_pad = pl.pallas_call(
        fused_head_kernel,
        out_shape=jax.ShapeDtypeStruct((Bp, LANE), jnp.float32),
        grid=grid,
        in_specs=[
            pl.BlockSpec((TB, H), lambda i: (i, 0)),        # x tile
            pl.BlockSpec((3, H, LANE), lambda i: (0, 0, 0)),  # weights (pinned)
            pl.BlockSpec((3, LANE), lambda i: (0, 0)),        # biases  (pinned)
        ],
        out_specs=pl.BlockSpec((TB, LANE), lambda i: (i, 0)),
        compiler_params=pltpu.CompilerParams(
            dimension_semantics=("parallel",),
        ),
        cost_estimate=cost,
    )(x_mean, W, Bias)

    return logits_pad[:B, :num_class]


# ----------------------------------------------------------------------------
# Deterministic stand-in for the pretrained BERT encoder body
# (embedding lookup + masked mean pool; plain-JAX glue).  The encoder's
# dense+tanh pooler is fused into the Pallas kernel above.
# ----------------------------------------------------------------------------
def stub_bert_token_features(input_ids, attn_masks, token_type_ids,
                             tok_emb, type_emb):
    emb = tok_emb[input_ids] + type_emb[token_type_ids]      # [B, S, H]
    mask = attn_masks.astype(jnp.float32)[..., None]         # [B, S, 1]
    summed = jnp.sum(emb * mask, axis=1)                     # [B, H]
    denom = jnp.maximum(jnp.sum(mask, axis=1), 1.0)          # [B, 1]
    return summed / denom                                    # [B, H]


# ----------------------------------------------------------------------------
# Pure-jnp reference for sanity checking the fused kernel.
# ----------------------------------------------------------------------------
def reference_forward(x_mean, pool_w, pool_b, w1, b1, w2, b2):
    pooled = jnp.tanh(x_mean @ pool_w + pool_b)
    h = jnp.maximum(pooled @ w1 + b1, 0.0)
    return h @ w2 + b2


if __name__ == "__main__":
    batch = 8
    seq = 16
    hidden = 128          # bert_config.hidden_size (small synthetic value)
    num_class = 4
    vocab = 64

    key = jax.random.PRNGKey(0)
    (k_ids, k_tok, k_type, k_pw, k_pb,
     k_w1, k_b1, k_w2, k_b2) = jax.random.split(key, 9)

    # Synthetic "tokenized" inputs (mirrors forward signature).
    input_ids = jax.random.randint(k_ids, (batch, seq), 0, vocab, dtype=jnp.int32)
    attn_masks = jnp.ones((batch, seq), dtype=jnp.int32)
    token_type_ids = jnp.zeros((batch, seq), dtype=jnp.int32)

    # Deterministic stub-BERT parameters.
    tok_emb = jax.random.normal(k_tok, (vocab, hidden), jnp.float32) * 0.02
    type_emb = jax.random.normal(k_type, (2, hidden), jnp.float32) * 0.02
    pool_w = jax.random.normal(k_pw, (hidden, hidden), jnp.float32) * 0.02
    pool_b = jax.random.normal(k_pb, (hidden,), jnp.float32) * 0.02

    # Classifier head parameters (fc1: hidden->64, fc2: 64->num_class),
    # stored as [in, out] (PyTorch Linear weight transposed), biases as [out].
    w1 = jax.random.normal(k_w1, (hidden, 64), jnp.float32) * 0.05
    b1 = jax.random.normal(k_b1, (64,), jnp.float32) * 0.05
    w2 = jax.random.normal(k_w2, (64, num_class), jnp.float32) * 0.05
    b2 = jax.random.normal(k_b2, (num_class,), jnp.float32) * 0.05

    # forward: token features (stub encoder body) -> fused Pallas head:
    #          pooler(tanh) -> fc1 -> ReLU -> dropout(identity) -> fc2
    x_mean = stub_bert_token_features(input_ids, attn_masks, token_type_ids,
                                      tok_emb, type_emb)
    logits = sentiment_classifier_forward(x_mean, pool_w, pool_b,
                                          w1, b1, w2, b2, num_class)
    logits = jax.block_until_ready(logits)

    # Sanity check against pure-jnp reference.
    ref = reference_forward(x_mean, pool_w, pool_b, w1, b1, w2, b2)
    assert logits.shape == (batch, num_class)
    assert jnp.allclose(logits, ref, atol=1e-4, rtol=1e-4)

    print("KERNEL_OK")
</pallas_src>

<mosaic_0001>
module attributes {stable_mosaic.version = 11 : i64} {
  func.func @fused_head_kernel(%arg0: i32, %arg1: memref<8x128xf32, #tpu.memory_space<vmem>>, %arg2: memref<3x128x128xf32, #tpu.memory_space<vmem>>, %arg3: memref<3x128xf32, #tpu.memory_space<vmem>>, %arg4: memref<8x128xf32, #tpu.memory_space<vmem>>) attributes {dimension_semantics = [#tpu.dimension_semantics<parallel>], iteration_bounds = array<i64: 1>, scalar_prefetch = 0 : i64, scratch_operands = 0 : i64, tpu.core_type = #tpu.core_type<tc>, window_params = [{transform_indices = @transform_0, window_bounds = array<i64: 8, 128>}, {pipeline_mode = #tpu.pipeline_mode<synchronous>, transform_indices = @transform_1, window_bounds = array<i64: 3, 128, 128>}, {pipeline_mode = #tpu.pipeline_mode<synchronous>, transform_indices = @transform_2, window_bounds = array<i64: 3, 128>}, {transform_indices = @transform_3, window_bounds = array<i64: 8, 128>}]} {
    %c0 = arith.constant 0 : index
    %c0_0 = arith.constant 0 : index
    %0 = vector.load %arg1[%c0, %c0_0] : memref<8x128xf32, #tpu.memory_space<vmem>>, vector<8x128xf32>
    %c0_1 = arith.constant 0 : index
    %c0_2 = arith.constant 0 : index
    %c0_3 = arith.constant 0 : index
    %1 = vector.load %arg2[%c0_1, %c0_2, %c0_3] : memref<3x128x128xf32, #tpu.memory_space<vmem>>, vector<1x128x128xf32>
    %2 = vector.shape_cast %1 : vector<1x128x128xf32> to vector<128x128xf32>
    %cst = arith.constant dense<0.000000e+00> : vector<8x128xf32>
    %3 = tpu.matmul %0, %2, %cst {dimension_numbers = #tpu.dot_dimension_numbers<[1], [0], [0], [1], [0, 0, 1, 1], [], []>} : vector<8x128xf32>, vector<128x128xf32>, vector<8x128xf32> -> vector<8x128xf32>
    %c0_4 = arith.constant 0 : index
    %c0_5 = arith.constant 0 : index
    %4 = vector.load %arg3[%c0_4, %c0_5] : memref<3x128xf32, #tpu.memory_space<vmem>>, vector<1x128xf32>
    %5 = vector.broadcast %4 : vector<1x128xf32> to vector<8x128xf32>
    %6 = arith.addf %3, %5 : vector<8x128xf32>
    %7 = math.tanh %6 : vector<8x128xf32>
    %c1 = arith.constant 1 : index
    %c0_6 = arith.constant 0 : index
    %c0_7 = arith.constant 0 : index
    %8 = vector.load %arg2[%c1, %c0_6, %c0_7] : memref<3x128x128xf32, #tpu.memory_space<vmem>>, vector<1x128x128xf32>
    %9 = vector.shape_cast %8 : vector<1x128x128xf32> to vector<128x128xf32>
    %cst_8 = arith.constant dense<0.000000e+00> : vector<8x128xf32>
    %10 = tpu.matmul %7, %9, %cst_8 {dimension_numbers = #tpu.dot_dimension_numbers<[1], [0], [0], [1], [0, 0, 1, 1], [], []>} : vector<8x128xf32>, vector<128x128xf32>, vector<8x128xf32> -> vector<8x128xf32>
    %c1_9 = arith.constant 1 : index
    %c0_10 = arith.constant 0 : index
    %11 = vector.load %arg3[%c1_9, %c0_10] : memref<3x128xf32, #tpu.memory_space<vmem>>, vector<1x128xf32>
    %12 = vector.broadcast %11 : vector<1x128xf32> to vector<8x128xf32>
    %13 = arith.addf %10, %12 : vector<8x128xf32>
    %cst_11 = arith.constant 0.000000e+00 : f32
    %14 = vector.broadcast %cst_11 : f32 to vector<8x128xf32>
    %15 = arith.maximumf %13, %14 : vector<8x128xf32>
    %c2 = arith.constant 2 : index
    %c0_12 = arith.constant 0 : index
    %c0_13 = arith.constant 0 : index
    %16 = vector.load %arg2[%c2, %c0_12, %c0_13] : memref<3x128x128xf32, #tpu.memory_space<vmem>>, vector<1x128x128xf32>
    %17 = vector.shape_cast %16 : vector<1x128x128xf32> to vector<128x128xf32>
    %cst_14 = arith.constant dense<0.000000e+00> : vector<8x128xf32>
    %18 = tpu.matmul %15, %17, %cst_14 {dimension_numbers = #tpu.dot_dimension_numbers<[1], [0], [0], [1], [0, 0, 1, 1], [], []>} : vector<8x128xf32>, vector<128x128xf32>, vector<8x128xf32> -> vector<8x128xf32>
    %c2_15 = arith.constant 2 : index
    %c0_16 = arith.constant 0 : index
    %19 = vector.load %arg3[%c2_15, %c0_16] : memref<3x128xf32, #tpu.memory_space<vmem>>, vector<1x128xf32>
    %20 = vector.broadcast %19 : vector<1x128xf32> to vector<8x128xf32>
    %21 = arith.addf %18, %20 : vector<8x128xf32>
    %c0_17 = arith.constant 0 : index
    %c0_18 = arith.constant 0 : index
    %22 = vector.load %arg4[%c0_17, %c0_18] : memref<8x128xf32, #tpu.memory_space<vmem>>, vector<8x128xf32>
    tpu.vector_store %arg4[%c0_17, %c0_18], %21 {strides = array<i32>} : memref<8x128xf32, #tpu.memory_space<vmem>>, vector<8x128xf32>,
    return
  }
  func.func @transform_0(%arg0: i32) -> (i32, i32) {
    %c0_i32 = arith.constant 0 : i32
    %c0_i32_0 = arith.constant 0 : i32
    return %arg0, %c0_i32 : i32, i32
  }
  func.func @transform_1(%arg0: i32) -> (i32, i32, i32) {
    %c0_i32 = arith.constant 0 : i32
    %c0_i32_0 = arith.constant 0 : i32
    %c0_i32_1 = arith.constant 0 : i32
    %c0_i32_2 = arith.constant 0 : i32
    return %c0_i32, %c0_i32_0, %c0_i32_1 : i32, i32, i32
  }
  func.func @transform_2(%arg0: i32) -> (i32, i32) {
    %c0_i32 = arith.constant 0 : i32
    %c0_i32_0 = arith.constant 0 : i32
    %c0_i32_1 = arith.constant 0 : i32
    return %c0_i32, %c0_i32_0 : i32, i32
  }
  func.func @transform_3(%arg0: i32) -> (i32, i32) {
    %c0_i32 = arith.constant 0 : i32
    %c0_i32_0 = arith.constant 0 : i32
    return %arg0, %c0_i32 : i32, i32
  }
}

</mosaic_0001>

<bundles_post_ra>
// kernel: sentiment_classifier_forward.1
= control target key start
LH: loop header
LB: loop body
LE: loop exit
PB: predicated region body
PF: predicated region fallthrough
CT: control target
= control target key end

     0   :  { %v565_v0 = vmov 0.0|0.0   ;;  %vm566_vm0 = vmmov 0   ;;  %v567_v4 = vmov 0.0   ;;  %s777_s1 = inlined_call_operand.vmem [shape: f32[3,128,128], index: 1, kind: input, shape index: {}]   ;;  %s778_s0 = inlined_call_operand.vmem [shape: f32[8,128], index: 0, kind: input, shape index: {}]   ;;  %s779_s2 = inlined_call_operand.vmem [shape: f32[3,128], index: 2, kind: input, shape index: {}]   ;;  %s780_s3 = inlined_call_operand.vmem [shape: f32[8,128], index: 3, kind: output, shape index: {}]  }
   0x1   :  { %488 = vmatprep.subr.bf16.mxu0 %v565_v0  ;;  %v15_v1 = vld [vmem:[%s777_s1] sm:$0xff]  ;;  %v16_v2 = vld [vmem:[%s777_s1 + $0x8] sm:$0xff]  ;;  %v17_v3 = vld [vmem:[%s777_s1 + $0x10] sm:$0xff]  ;;  %415 = vmatprep.mubr.msk.f32.mxu0 %vm566_vm0, %v567_v4 }
   0x2   :  { %v489_v5 = vpack.c.bf16 %v16_v2, %v15_v1  ;;  %v18_v6 = vld [vmem:[%s777_s1 + $0x18] sm:$0xff]  ;;  %512 = vmatprep.subr.bf16.mxu1 %v565_v0  ;;  %450 = vmatprep.mubr.msk.f32.mxu1 %vm566_vm0, %v567_v4  ;;  %v19_v8 = vld [vmem:[%s777_s1 + $0x20] sm:$0xff]  ;;  %v20_v9 = vld [vmem:[%s777_s1 + $0x28] sm:$0xff] }
   0x3   :  { %v492_v7 = vpack.c.bf16 %v18_v6, %v17_v3  ;;  %v298_v10 = vld [vmem:[%s777_s1 + $0x80] sm:$0xff]  ;;  %v299_v11 = vld [vmem:[%s777_s1 + $0x88] sm:$0xff]  ;;  %v300_v12 = vld [vmem:[%s777_s1 + $0x90] sm:$0xff]  ;;  %v495_v14 = vpack.c.bf16 %v20_v9, %v19_v8 }
   0x4   :  { %490 = vmatpush3.bf16.msra.mxu0 %v489_v5  ;;  %v301_v13 = vld [vmem:[%s777_s1 + $0x98] sm:$0xff]  ;;  %v513_v15 = vpack.c.bf16 %v299_v11, %v298_v10  ;;  %v21_v16 = vld [vmem:[%s777_s1 + $0x30] sm:$0xff]  ;;  %v302_v19 = vld [vmem:[%s777_s1 + $0xa0] sm:$0xff] }
   0x5   :  { %491 = vmatprep.subr.bf16.mxu0 %v565_v0  ;;  %v22_v17 = vld [vmem:[%s777_s1 + $0x38] sm:$0xff]  ;;  %v516_v18 = vpack.c.bf16 %v301_v13, %v300_v12  ;;  %v303_v20 = vld [vmem:[%s777_s1 + $0xa8] sm:$0xff]  ;;  %v23_v22 = vld [vmem:[%s777_s1 + $0x40] sm:$0xff] }
   0x6   :  { %514 = vmatpush3.bf16.msra.mxu1 %v513_v15  ;;  %v498_v21 = vpack.c.bf16 %v22_v17, %v21_v16  ;;  %v24_v23 = vld [vmem:[%s777_s1 + $0x48] sm:$0xff]  ;;  %v519_v24 = vpack.c.bf16 %v303_v20, %v302_v19  ;;  %v304_v25 = vld [vmem:[%s777_s1 + $0xb0] sm:$0xff]  ;;  %v305_v26 = vld [vmem:[%s777_s1 + $0xb8] sm:$0xff] }
   0x7   :  { %515 = vmatprep.subr.bf16.mxu1 %v565_v0  ;;  %v501_v27 = vpack.c.bf16 %v24_v23, %v23_v22  ;;  %v25_v28 = vld [vmem:[%s777_s1 + $0x50] sm:$0xff]  ;;  %v26_v29 = vld [vmem:[%s777_s1 + $0x58] sm:$0xff]  ;;  %v522_v30 = vpack.c.bf16 %v305_v26, %v304_v25  ;;  %v306_v31 = vld [vmem:[%s777_s1 + $0xc0] sm:$0xff] }
   0x8   :  { %493 = vmatpush3.bf16.msra.mxu0 %v492_v7  ;;  %v307_v32 = vld [vmem:[%s777_s1 + $0xc8] sm:$0xff]  ;;  %v504_v33 = vpack.c.bf16 %v26_v29, %v25_v28  ;;  %v27_v34 = vld [vmem:[%s777_s1 + $0x60] sm:$0xff]  ;;  %v29_v38 = vld [vmem:[%s777_s1 + $0x70] sm:$0xff] }
   0x9   :  { %494 = vmatprep.subr.bf16.mxu0 %v565_v0  ;;  %v28_v35 = vld [vmem:[%s777_s1 + $0x68] sm:$0xff]  ;;  %v525_v36 = vpack.c.bf16 %v307_v32, %v306_v31  ;;  %v30_v39 = vld [vmem:[%s777_s1 + $0x78] sm:$0xff]  ;;  %v14_v41 = vld [vmem:[%s778_s0] sm:$0xff] }
   0xa   :  { %517 = vmatpush3.bf16.msra.mxu1 %v516_v18  ;;  %v507_v37 = vpack.c.bf16 %v28_v35, %v27_v34  ;;  %v510_v40 = vpack.c.bf16 %v30_v39, %v29_v38  ;;  %v308_v42 = vld [vmem:[%s777_s1 + $0xd0] sm:$0xff]  ;;  %v309_v43 = vld [vmem:[%s777_s1 + $0xd8] sm:$0xff]  ;;  %v310_v45 = vld [vmem:[%s777_s1 + $0xe0] sm:$0xff] }
   0xb   :  { %518 = vmatprep.subr.bf16.mxu1 %v565_v0  ;;  %v528_v44 = vpack.c.bf16 %v309_v43, %v308_v42  ;;  %v311_v46 = vld [vmem:[%s777_s1 + $0xe8] sm:$0xff]  ;;  %v312_v48 = vld [vmem:[%s777_s1 + $0xf0] sm:$0xff]  ;;  %v313_v49 = vld [vmem:[%s777_s1 + $0xf8] sm:$0xff] }
   0xc   :  { %496 = vmatpush3.bf16.msra.mxu0 %v495_v14  ;;  %v531_v47 = vpack.c.bf16 %v311_v46, %v310_v45  ;;  %v534_v50 = vpack.c.bf16 %v313_v49, %v312_v48  ;;  %v315_v51 = vld [vmem:[%s777_s1 + $0x100] sm:$0xff]  ;;  %v316_v52 = vld [vmem:[%s777_s1 + $0x108] sm:$0xff]  ;;  %v317_v53 = vld [vmem:[%s777_s1 + $0x110] sm:$0xff] }
   0xd   :  { %497 = vmatprep.subr.bf16.mxu0 %v565_v0  ;;  %v537_v54 = vpack.c.bf16 %v316_v52, %v315_v51  ;;  %v318_v55 = vld [vmem:[%s777_s1 + $0x118] sm:$0xff]  ;;  %v319_v57 = vld [vmem:[%s777_s1 + $0x120] sm:$0xff]  ;;  %v320_v58 = vld [vmem:[%s777_s1 + $0x128] sm:$0xff] }
   0xe   :  { %520 = vmatpush3.bf16.msra.mxu1 %v519_v24  ;;  %v540_v56 = vpack.c.bf16 %v318_v55, %v317_v53  ;;  %v543_v59 = vpack.c.bf16 %v320_v58, %v319_v57  ;;  %v321_v60 = vld [vmem:[%s777_s1 + $0x130] sm:$0xff]  ;;  %v322_v61 = vld [vmem:[%s777_s1 + $0x138] sm:$0xff]  ;;  %v323_v63 = vld [vmem:[%s777_s1 + $0x140] sm:$0xff] }
   0xf   :  { %521 = vmatprep.subr.bf16.mxu1 %v565_v0  ;;  %v546_v62 = vpack.c.bf16 %v322_v61, %v321_v60  ;;  %v324_v1 = vld [vmem:[%s777_s1 + $0x148] sm:$0xff]  ;;  %v325_v3 = vld [vmem:[%s777_s1 + $0x150] sm:$0xff]  ;;  %v327_v6 = vld [vmem:[%s777_s1 + $0x160] sm:$0xff] }
  0x10   :  { %499 = vmatpush3.bf16.msra.mxu0 %v498_v21  ;;  %v549_v2 = vpack.c.bf16 %v324_v1, %v323_v63  ;;  %v328_v7 = vld [vmem:[%s777_s1 + $0x168] sm:$0xff]  ;;  %v297_v9 = vld [vmem:[%s779_s2] ss:$0 sm:$0xff]  ;;  %v329_v14 = vld [vmem:[%s777_s1 + $0x170] sm:$0xff] }
  0x11   :  { %500 = vmatprep.subr.bf16.mxu0 %v565_v0  ;;  %v555_v8 = vpack.c.bf16 %v328_v7, %v327_v6  ;;  %v330_v15 = vld [vmem:[%s777_s1 + $0x178] sm:$0xff]  ;;  %v331_v21 = vld [vmem:[%s779_s2 + $0x2] ss:$0 sm:$0xff] }
  0x12   :  { %523 = vmatpush3.bf16.msra.mxu1 %v522_v30  ;;  %v558_v16 = vpack.c.bf16 %v330_v15, %v329_v14 }
  0x13   :  { %524 = vmatprep.subr.bf16.mxu1 %v565_v0 }
  0x14   :  { %502 = vmatpush3.bf16.msra.mxu0 %v501_v27 }
  0x15   :  { %503 = vmatprep.subr.bf16.mxu0 %v565_v0 }
  0x16   :  { %526 = vmatpush3.bf16.msra.mxu1 %v525_v36 }
  0x17   :  { %527 = vmatprep.subr.bf16.mxu1 %v565_v0 }
  0x18   :  { %505 = vmatpush3.bf16.msra.mxu0 %v504_v33 }
  0x19   :  { %506 = vmatprep.subr.bf16.mxu0 %v565_v0 }
  0x1a   :  { %529 = vmatpush3.bf16.msra.mxu1 %v528_v44 }
  0x1b   :  { %530 = vmatprep.subr.bf16.mxu1 %v565_v0 }
  0x1c   :  { %508 = vmatpush3.bf16.msra.mxu0 %v507_v37 }
  0x1d   :  { %509 = vmatprep.subr.bf16.mxu0 %v565_v0 }
  0x1e   :  { %532 = vmatpush3.bf16.msra.mxu1 %v531_v47 }
  0x1f   :  { %533 = vmatprep.subr.bf16.mxu1 %v565_v0 }
  0x20   :  { %511 = vmatpush3.bf16.msra.mxu0 %v510_v40 }
  0x21   :  { %536 = vmatprep.subr.bf16.mxu0 %v565_v0 }
  0x22   :  { %535 = vmatpush3.bf16.msra.mxu1 %v534_v50 }
  0x23   :  { %416 = vmatmul.mubr.f32.vlgmr.msra.gmra.mrb[0].mxu0 %v14_v41 }
  0x24   :  { %485 = vmatprep.mubr.msk.f32.mxu0 %vm566_vm0, %v567_v4  ;;  %538 = vmatpush3.bf16.msra.mxu0 %v537_v54  ;;  %v326_v4 = vld [vmem:[%s777_s1 + $0x158] sm:$0xff] }
  0x25   :  { %539 = vmatprep.subr.bf16.mxu0 %v565_v0  ;;  %v552_v5 = vpack.c.bf16 %v326_v4, %v325_v3 }
  0x28   :  { %541 = vmatpush3.bf16.msra.mxu0 %v540_v56 }
  0x29   :  { %542 = vmatprep.subr.bf16.mxu0 %v565_v0 }
  0x2c   :  { %544 = vmatpush3.bf16.msra.mxu0 %v543_v59 }
  0x2d   :  { %545 = vmatprep.subr.bf16.mxu0 %v565_v0 }
  0x30   :  { %547 = vmatpush3.bf16.msra.mxu0 %v546_v62 }
  0x31   :  { %548 = vmatprep.subr.bf16.mxu0 %v565_v0 }
  0x34   :  { %550 = vmatpush3.bf16.msra.mxu0 %v549_v2 }
  0x35   :  { %551 = vmatprep.subr.bf16.mxu0 %v565_v0 }
  0x38   :  { %553 = vmatpush3.bf16.msra.mxu0 %v552_v5 }
  0x39   :  { %554 = vmatprep.subr.bf16.mxu0 %v565_v0 }
  0x3c   :  { %556 = vmatpush3.bf16.msra.mxu0 %v555_v8 }
  0x3d   :  { %557 = vmatprep.subr.bf16.mxu0 %v565_v0  ;;  %v314_v0 = vld [vmem:[%s779_s2 + $0x1] ss:$0 sm:$0xff] }
  0x40   :  { %559 = vmatpush3.bf16.msra.mxu0 %v558_v16 }
  0xf6   :  { %v102_v10 = vpop.f32.mrb[0].mxu0 }
  0xf7   :  { %v103_v11 = vadd.f32 %v297_v9, %v102_v10  ;;  %v417_v12 = vpop.f32.mrb[1].mxu0 }
  0xf9   :  { %563 = vtanh.f32 %v103_v11 }
 0x103   :  { %v564_v13 = vpop.eup %563 }
 0x104   :  { %451 = vmatmul.mubr.f32.vlgmr.msra.gmra.mrb[0].mxu1 %v564_v13 }
 0x1d7   :  { %v195_v17 = vpop.f32.mrb[0].mxu1 }
 0x1d8   :  { %v196_v18 = vadd.f32 %v314_v0, %v195_v17  ;;  %v452_v19 = vpop.f32.mrb[1].mxu1 }
 0x1da   :  { %v199_v20 = vmax.f32 %v196_v18, 0.0 }
 0x1dc   :  { %486 = vmatmul.mubr.f32.vlgmr.msra.gmra.mrb[2].mxu0 %v199_v20 }
 0x2af   :  { %v288_v22 = vpop.f32.mrb[2].mxu0 }
 0x2b0   :  { %v289_v23 = vadd.f32 %v331_v21, %v288_v22  ;;  %v487_v24 = vpop.f32.mrb[3].mxu0 }
 0x2b2   :  { %292 = vst [vmem:[%s780_s3] sm:$0xff] %v289_v23 }

</bundles_post_ra>
